<compile_context>
chip_gen: v7x
topology: tpu7x:2x2x1
jax: 0.10.0
libtpu: 0.0.40
codegen_flags: <defaults>
</compile_context>

<pallas_src>
import functools

import jax
import jax.numpy as jnp
from jax import lax
from jax.experimental import pallas as pl
from jax.experimental.pallas import tpu as pltpu


def aggr_kernel(x_ref, w_enc_ref, b_enc_ref, w_plan_ref, b_plan_ref,
                mask_ref, o_ref, *, block_b, obj_num):
    # x_ref:      (Bb*N, D)   Bb batch elements, rows = batch-major objects
    # w_enc_ref:  (D, H)      encoder weight, pre-transposed for x @ W
    # b_enc_ref:  (1, H)
    # w_plan_ref: (2, H)      planner weight in its native (out, in) layout
    # b_plan_ref: (2, 1)
    # mask_ref:   (1, Bb*N)   objects on the lane axis
    # o_ref:      (2, Bb*N)   transposed plan, objects on the lane axis
    m = block_b * obj_num
    h = w_enc_ref.shape[1]

    # encoder: (M, D) @ (D, H) on the MXU, f32 accumulation (bf16 or f32 in).
    x1 = jnp.dot(x_ref[...], w_enc_ref[...],
                 preferred_element_type=jnp.float32) + b_enc_ref[...]     # (M, H)

    # MaxPool1d(obj_num): per-batch max over the object (sublane) axis,
    # broadcast-add back.  obj_num is sublane-aligned (multiple of 8) because
    # the wrapper pads ragged object counts.
    x1_b = x1.reshape(block_b, obj_num, h)
    g = jnp.max(x1_b, axis=1, keepdims=True)                              # (Bb, 1, H)
    aggr = (x1_b + g).reshape(m, h)                                       # (M, H)

    # planner computed transposed: plan_t[c, m] = sum_h w_plan[c,h]*aggr[m,h],
    # so the store below is lane-dense (objects on lanes, no masked vst).
    plan_t = lax.dot_general(
        w_plan_ref[...], aggr,
        dimension_numbers=(((1,), (1,)), ((), ())),
        preferred_element_type=jnp.float32) + b_plan_ref[...]             # (2, M)

    # mask broadcast over the 2 plan channels == PyTorch permute/mul/permute.
    o_ref[...] = plan_t * mask_ref[...].astype(jnp.float32)               # (2, M)


def _vmem_limit_bytes():
    """Scoped VMEM limit ~ half of physical capacity (v5e/v6e 128 MiB -> 64,
    v7x 64 MiB -> 32); conservative 32 MiB fallback if the query fails."""
    try:
        cap = int(pltpu.get_tpu_info().vmem_capacity_bytes)
    except Exception:
        cap = 64 << 20
    cap = min(max(cap, 32 << 20), 128 << 20)
    return cap // 2


def _max_block_rows(d, h, in_itemsize, mask_itemsize, vmem_limit):
    """Max rows m per grid step that fit the VMEM budget.

    Per-step live bytes ~ 2*m*d*in_item   (x double buffer)
                        + 2*m*h*4         (x1 / aggr f32 temporaries)
                        + m*2*4           (plan_t)
                        + 2*m*2*4         (output double buffer)
                        + 2*m*mask_item   (mask double buffer)
    plus resident weights/biases."""
    row_bytes = 2 * d * in_itemsize + 2 * h * 4 + 8 + 16 + 2 * mask_itemsize
    resident = 2 * d * h * in_itemsize + 8 * h + 64
    budget = int(vmem_limit * 0.8) - resident
    return max(8, budget // row_bytes)


def _pick_block_b(batch, obj_n, max_rows):
    """Pick Bb batch elements per grid step.

    Hard constraints: Bb divides batch, and Bb*obj_n is a multiple of 128
    lanes (dense writeback) OR Bb == batch (full-extent blocks are legal).
    Preference order: fits the VMEM row budget, >=2 pipelined steps,
    >=4 steps (2 per TensorCore on v7x megacore), then biggest tile."""
    valid = []
    for bb in range(1, batch + 1):
        if batch % bb:
            continue
        if (bb * obj_n) % 128 != 0 and bb != batch:
            continue
        valid.append(bb)
    fitting = [bb for bb in valid if bb * obj_n <= max_rows]
    # If nothing fits the budget, take the smallest lane-legal block rather
    # than the whole batch.  (Splitting the object axis itself is not needed
    # at realistic N*D; would require a second grid axis.)
    pool = fitting if fitting else [min(valid)]

    def score(bb):
        steps = batch // bb
        return (steps >= 2, steps >= 4, bb * obj_n)

    return max(pool, key=score)


def aggr_forward(x, mask, w_enc, b_enc, w_plan, b_plan,
                 *, compute_dtype=jnp.bfloat16):
    """x: (B, N, D) f32, mask: (B, 1, N) f32 -> (B, N, 2) f32.

    compute_dtype=bf16 (default) halves HBM traffic for x / w_enc / mask;
    accumulation stays f32 on the MXU.  Pass jnp.float32 for exact results.
    """
    B, N, D = x.shape
    H = w_enc.shape[0]

    # Sublane alignment: pad the object axis to a multiple of 8 with copies of
    # object 0 (duplicates cannot change the per-batch max); padded mask = 0
    # and padded outputs are sliced off below.
    n_pad = (-N) % 8
    if n_pad:
        x = jnp.concatenate(
            [x, jnp.broadcast_to(x[:, :1, :], (B, n_pad, D))], axis=1)
        mask = jnp.concatenate(
            [mask, jnp.zeros((B, 1, n_pad), mask.dtype)], axis=2)
    Np = N + n_pad

    in_itemsize = jnp.dtype(compute_dtype).itemsize
    vmem_limit = _vmem_limit_bytes()
    max_rows = _max_block_rows(D, H, in_itemsize, in_itemsize, vmem_limit)
    bb = _pick_block_b(B, Np, max_rows)
    steps = B // bb
    m = bb * Np

    # Wrapper-side layout plumbing (cheap for XLA):
    x_flat = x.reshape(B * Np, D).astype(compute_dtype)       # (B*Np, D)
    w_enc_t = jnp.transpose(w_enc).astype(compute_dtype)      # (D, H)
    b_enc_r = b_enc.reshape(1, H).astype(jnp.float32)         # (1, H)
    w_plan_r = w_plan.astype(jnp.float32)                     # (2, H)  tiny
    b_plan_r = b_plan.reshape(2, 1).astype(jnp.float32)       # (2, 1)
    mask_flat = mask.reshape(1, B * Np).astype(compute_dtype)  # (1, B*Np)

    cost = pl.CostEstimate(
        flops=2 * B * Np * D * H + 2 * B * Np * H * 2,
        transcendentals=0,
        bytes_accessed=int(B * Np * D * in_itemsize + D * H * in_itemsize
                           + (H + 2 * H + 2) * 4
                           + B * Np * in_itemsize        # mask
                           + 2 * B * Np * 4))            # output

    kernel = functools.partial(aggr_kernel, block_b=bb, obj_num=Np)

    def run(single_buffer_w):
        # The encoder weight block never changes -> no point double-buffering
        # it (saves VMEM, matters most on v7x's 64 MiB per TC).
        w_kwargs = {"pipeline_mode": pl.Buffered(1)} if single_buffer_w else {}
        return pl.pallas_call(
            kernel,
            out_shape=jax.ShapeDtypeStruct((2, B * Np), jnp.float32),
            grid_spec=pltpu.PrefetchScalarGridSpec(
                num_scalar_prefetch=0,
                grid=(steps,),
                in_specs=[
                    pl.BlockSpec((m, D), lambda b: (b, 0)),              # x
                    pl.BlockSpec((D, H), lambda b: (0, 0), **w_kwargs),  # w_enc^T
                    pl.BlockSpec((1, H), lambda b: (0, 0)),              # b_enc
                    pl.BlockSpec((2, H), lambda b: (0, 0)),              # w_plan
                    pl.BlockSpec((2, 1), lambda b: (0, 0)),              # b_plan
                    pl.BlockSpec((1, m), lambda b: (0, b)),              # mask
                ],
                out_specs=pl.BlockSpec((2, m), lambda b: (0, b)),        # plan^T
            ),
            compiler_params=pltpu.CompilerParams(
                dimension_semantics=("parallel",),
                vmem_limit_bytes=vmem_limit),
            cost_estimate=cost,
        )(x_flat, w_enc_t, b_enc_r, w_plan_r, b_plan_r, mask_flat)

    try:
        out_t = run(single_buffer_w=True)
        out_t.block_until_ready()
    except Exception:
        # Fallback for JAX versions / shapes where pipeline_mode is rejected.
        out_t = run(single_buffer_w=False)

    # (2, B*Np) -> (B, Np, 2); single wrapper-side transpose back, drop pad.
    out = jnp.transpose(out_t.reshape(2, B, Np), (1, 2, 0))
    if n_pad:
        out = out[:, :N, :]
    return out


def aggr_reference(x, mask, w_enc, b_enc, w_plan, b_plan):
    """Pure-JAX mirror of the PyTorch forward, for verification."""
    x1 = jnp.einsum('bnd,hd->bnh', x, w_enc) + b_enc
    g = jnp.max(x1, axis=1, keepdims=True)
    aggr = x1 + g
    plan = jnp.einsum('bnh,oh->bno', aggr, w_plan) + b_plan
    return jnp.transpose(jnp.transpose(plan, (0, 2, 1)) * mask, (0, 2, 1))


if __name__ == "__main__":
    # Small shapes consistent with the module; B*N chosen so the default path
    # gets two 128-lane-wide pipelined grid steps.
    B, obj_num, input_dim, hidden_dim = 16, 16, 16, 32

    key = jax.random.PRNGKey(0)
    k_x, k_m, k_we, k_be, k_wp, k_bp, k_x2, k_m2 = jax.random.split(key, 8)

    x = jax.random.normal(k_x, (B, obj_num, input_dim), dtype=jnp.float32)
    mask = (jax.random.uniform(k_m, (B, 1, obj_num)) > 0.3).astype(jnp.float32)

    # nn.Linear parameter shapes: weight (out, in), bias (out,)
    w_enc = jax.random.normal(k_we, (hidden_dim, input_dim), jnp.float32) * 0.1
    b_enc = jax.random.normal(k_be, (hidden_dim,), jnp.float32) * 0.1
    w_plan = jax.random.normal(k_wp, (2, hidden_dim), jnp.float32) * 0.1
    b_plan = jax.random.normal(k_bp, (2,), jnp.float32) * 0.1

    ref = aggr_reference(x, mask, w_enc, b_enc, w_plan, b_plan)

    # Default bf16-input path (production config: HBM-bound, f32 accumulation).
    out_bf16 = jax.block_until_ready(
        aggr_forward(x, mask, w_enc, b_enc, w_plan, b_plan))
    assert out_bf16.shape == (B, obj_num, 2)
    assert jnp.allclose(out_bf16, ref, atol=3e-2, rtol=3e-2), \
        "bf16 path mismatch vs reference"

    # Exact f32 path (same kernel, f32 inputs) for strict verification.
    out_f32 = jax.block_until_ready(
        aggr_forward(x, mask, w_enc, b_enc, w_plan, b_plan,
                     compute_dtype=jnp.float32))
    assert jnp.allclose(out_f32, ref, atol=1e-5, rtol=1e-5), \
        "f32 path mismatch vs reference"

    # Ragged object count (obj_num % 8 != 0): exercises the sublane-padding path.
    B2, N2 = 8, 12
    x2 = jax.random.normal(k_x2, (B2, N2, input_dim), dtype=jnp.float32)
    mask2 = (jax.random.uniform(k_m2, (B2, 1, N2)) > 0.3).astype(jnp.float32)
    ref2 = aggr_reference(x2, mask2, w_enc, b_enc, w_plan, b_plan)
    out2 = jax.block_until_ready(
        aggr_forward(x2, mask2, w_enc, b_enc, w_plan, b_plan))
    assert out2.shape == (B2, N2, 2)
    assert jnp.allclose(out2, ref2, atol=3e-2, rtol=3e-2), \
        "padded-obj_num path mismatch vs reference"

    print("KERNEL_OK")
</pallas_src>

<mosaic_0001>
module attributes {stable_mosaic.version = 11 : i64} {
  func.func @aggr_kernel(%arg0: i32, %arg1: memref<128x16xbf16, #tpu.memory_space<vmem>>, %arg2: memref<16x32xbf16, #tpu.memory_space<vmem>>, %arg3: memref<1x32xf32, #tpu.memory_space<vmem>>, %arg4: memref<2x32xf32, #tpu.memory_space<vmem>>, %arg5: memref<2x1xf32, #tpu.memory_space<vmem>>, %arg6: memref<1x128xbf16, #tpu.memory_space<vmem>>, %arg7: memref<2x128xf32, #tpu.memory_space<vmem>>) attributes {dimension_semantics = [#tpu.dimension_semantics<parallel>], iteration_bounds = array<i64: 2>, scalar_prefetch = 0 : i64, scratch_operands = 0 : i64, tpu.core_type = #tpu.core_type<tc>, window_params = [{transform_indices = @transform_0, window_bounds = array<i64: 128, 16>}, {pipeline_mode = #tpu.pipeline_mode<synchronous>, transform_indices = @transform_1, window_bounds = array<i64: 16, 32>}, {pipeline_mode = #tpu.pipeline_mode<synchronous>, transform_indices = @transform_2, window_bounds = array<i64: 1, 32>}, {pipeline_mode = #tpu.pipeline_mode<synchronous>, transform_indices = @transform_3, window_bounds = array<i64: 2, 32>}, {pipeline_mode = #tpu.pipeline_mode<synchronous>, transform_indices = @transform_4, window_bounds = array<i64: 2, 1>}, {transform_indices = @transform_5, window_bounds = array<i64: 1, 128>}, {transform_indices = @transform_6, window_bounds = array<i64: 2, 128>}]} {
    %c0 = arith.constant 0 : index
    %c0_0 = arith.constant 0 : index
    %0 = vector.load %arg1[%c0, %c0_0] : memref<128x16xbf16, #tpu.memory_space<vmem>>, vector<128x16xbf16>
    %c0_1 = arith.constant 0 : index
    %c0_2 = arith.constant 0 : index
    %1 = vector.load %arg2[%c0_1, %c0_2] : memref<16x32xbf16, #tpu.memory_space<vmem>>, vector<16x32xbf16>
    %cst = arith.constant dense<0.000000e+00> : vector<128x32xf32>
    %2 = tpu.matmul %0, %1, %cst {dimension_numbers = #tpu.dot_dimension_numbers<[1], [0], [0], [1], [0, 0, 1, 1], [], []>} : vector<128x16xbf16>, vector<16x32xbf16>, vector<128x32xf32> -> vector<128x32xf32>
    %c0_3 = arith.constant 0 : index
    %c0_4 = arith.constant 0 : index
    %3 = vector.load %arg3[%c0_3, %c0_4] : memref<1x32xf32, #tpu.memory_space<vmem>>, vector<1x32xf32>
    %4 = vector.broadcast %3 : vector<1x32xf32> to vector<128x32xf32>
    %5 = arith.addf %2, %4 : vector<128x32xf32>
    %6 = vector.shape_cast %5 : vector<128x32xf32> to vector<8x16x32xf32>
    %cst_5 = arith.constant dense<0xFF800000> : vector<8x32xf32>
    %7 = vector.multi_reduction <maximumf>, %6, %cst_5 [1] : vector<8x16x32xf32> to vector<8x32xf32>
    %8 = vector.shape_cast %7 : vector<8x32xf32> to vector<8x1x32xf32>
    %9 = vector.broadcast %8 : vector<8x1x32xf32> to vector<8x16x32xf32>
    %10 = arith.addf %6, %9 : vector<8x16x32xf32>
    %11 = vector.shape_cast %10 : vector<8x16x32xf32> to vector<128x32xf32>
    %c0_6 = arith.constant 0 : index
    %c0_7 = arith.constant 0 : index
    %12 = vector.load %arg4[%c0_6, %c0_7] : memref<2x32xf32, #tpu.memory_space<vmem>>, vector<2x32xf32>
    %cst_8 = arith.constant dense<0.000000e+00> : vector<2x128xf32>
    %13 = tpu.matmul %12, %11, %cst_8 {dimension_numbers = #tpu.dot_dimension_numbers<[1], [1], [0], [0], [0, 0, 1, 0], [], []>} : vector<2x32xf32>, vector<128x32xf32>, vector<2x128xf32> -> vector<2x128xf32>
    %c0_9 = arith.constant 0 : index
    %c0_10 = arith.constant 0 : index
    %14 = vector.load %arg5[%c0_9, %c0_10] : memref<2x1xf32, #tpu.memory_space<vmem>>, vector<2x1xf32>
    %15 = vector.broadcast %14 : vector<2x1xf32> to vector<2x128xf32>
    %16 = arith.addf %13, %15 : vector<2x128xf32>
    %c0_11 = arith.constant 0 : index
    %c0_12 = arith.constant 0 : index
    %17 = vector.load %arg6[%c0_11, %c0_12] : memref<1x128xbf16, #tpu.memory_space<vmem>>, vector<1x128xbf16>
    %18 = arith.extf %17 : vector<1x128xbf16> to vector<1x128xf32>
    %19 = vector.broadcast %18 : vector<1x128xf32> to vector<2x128xf32>
    %20 = arith.mulf %16, %19 : vector<2x128xf32>
    %c0_13 = arith.constant 0 : index
    %c0_14 = arith.constant 0 : index
    %21 = vector.load %arg7[%c0_13, %c0_14] : memref<2x128xf32, #tpu.memory_space<vmem>>, vector<2x128xf32>
    tpu.vector_store %arg7[%c0_13, %c0_14], %20 {strides = array<i32>} : memref<2x128xf32, #tpu.memory_space<vmem>>, vector<2x128xf32>,
    return
  }
  func.func @transform_0(%arg0: i32) -> (i32, i32) {
    %c0_i32 = arith.constant 0 : i32
    %c0_i32_0 = arith.constant 0 : i32
    return %arg0, %c0_i32 : i32, i32
  }
  func.func @transform_1(%arg0: i32) -> (i32, i32) {
    %c0_i32 = arith.constant 0 : i32
    %c0_i32_0 = arith.constant 0 : i32
    %c0_i32_1 = arith.constant 0 : i32
    return %c0_i32, %c0_i32_0 : i32, i32
  }
  func.func @transform_2(%arg0: i32) -> (i32, i32) {
    %c0_i32 = arith.constant 0 : i32
    %c0_i32_0 = arith.constant 0 : i32
    %c0_i32_1 = arith.constant 0 : i32
    return %c0_i32, %c0_i32_0 : i32, i32
  }
  func.func @transform_3(%arg0: i32) -> (i32, i32) {
    %c0_i32 = arith.constant 0 : i32
    %c0_i32_0 = arith.constant 0 : i32
    %c0_i32_1 = arith.constant 0 : i32
    return %c0_i32, %c0_i32_0 : i32, i32
  }
  func.func @transform_4(%arg0: i32) -> (i32, i32) {
    %c0_i32 = arith.constant 0 : i32
    %c0_i32_0 = arith.constant 0 : i32
    %c0_i32_1 = arith.constant 0 : i32
    return %c0_i32, %c0_i32_0 : i32, i32
  }
  func.func @transform_5(%arg0: i32) -> (i32, i32) {
    %c0_i32 = arith.constant 0 : i32
    %c0_i32_0 = arith.constant 0 : i32
    return %c0_i32, %arg0 : i32, i32
  }
  func.func @transform_6(%arg0: i32) -> (i32, i32) {
    %c0_i32 = arith.constant 0 : i32
    %c0_i32_0 = arith.constant 0 : i32
    return %c0_i32, %arg0 : i32, i32
  }
}

module attributes {stable_mosaic.version = 11 : i64} {
  func.func @aggr_kernel(%arg0: i32, %arg1: memref<128x16xbf16, #tpu.memory_space<vmem>>, %arg2: memref<16x32xbf16, #tpu.memory_space<vmem>>, %arg3: memref<1x32xf32, #tpu.memory_space<vmem>>, %arg4: memref<2x32xf32, #tpu.memory_space<vmem>>, %arg5: memref<2x1xf32, #tpu.memory_space<vmem>>, %arg6: memref<1x128xbf16, #tpu.memory_space<vmem>>, %arg7: memref<2x128xf32, #tpu.memory_space<vmem>>) attributes {dimension_semantics = [#tpu.dimension_semantics<parallel>], iteration_bounds = array<i64: 2>, scalar_prefetch = 0 : i64, scratch_operands = 0 : i64, tpu.core_type = #tpu.core_type<tc>, window_params = [{transform_indices = @transform_0, window_bounds = array<i64: 128, 16>}, {pipeline_mode = #tpu.pipeline_mode<synchronous>, transform_indices = @transform_1, window_bounds = array<i64: 16, 32>}, {pipeline_mode = #tpu.pipeline_mode<synchronous>, transform_indices = @transform_2, window_bounds = array<i64: 1, 32>}, {pipeline_mode = #tpu.pipeline_mode<synchronous>, transform_indices = @transform_3, window_bounds = array<i64: 2, 32>}, {pipeline_mode = #tpu.pipeline_mode<synchronous>, transform_indices = @transform_4, window_bounds = array<i64: 2, 1>}, {transform_indices = @transform_5, window_bounds = array<i64: 1, 128>}, {transform_indices = @transform_6, window_bounds = array<i64: 2, 128>}]} {
    %c0 = arith.constant 0 : index
    %c0_0 = arith.constant 0 : index
    %0 = vector.load %arg1[%c0, %c0_0] : memref<128x16xbf16, #tpu.memory_space<vmem>>, vector<128x16xbf16>
    %c0_1 = arith.constant 0 : index
    %c0_2 = arith.constant 0 : index
    %1 = vector.load %arg2[%c0_1, %c0_2] : memref<16x32xbf16, #tpu.memory_space<vmem>>, vector<16x32xbf16>
    %cst = arith.constant dense<0.000000e+00> : vector<128x32xf32>
    %2 = tpu.matmul %0, %1, %cst {dimension_numbers = #tpu.dot_dimension_numbers<[1], [0], [0], [1], [0, 0, 1, 1], [], []>} : vector<128x16xbf16>, vector<16x32xbf16>, vector<128x32xf32> -> vector<128x32xf32>
    %c0_3 = arith.constant 0 : index
    %c0_4 = arith.constant 0 : index
    %3 = vector.load %arg3[%c0_3, %c0_4] : memref<1x32xf32, #tpu.memory_space<vmem>>, vector<1x32xf32>
    %4 = vector.broadcast %3 : vector<1x32xf32> to vector<128x32xf32>
    %5 = arith.addf %2, %4 : vector<128x32xf32>
    %6 = vector.shape_cast %5 : vector<128x32xf32> to vector<8x16x32xf32>
    %cst_5 = arith.constant dense<0xFF800000> : vector<8x32xf32>
    %7 = vector.multi_reduction <maximumf>, %6, %cst_5 [1] : vector<8x16x32xf32> to vector<8x32xf32>
    %8 = vector.shape_cast %7 : vector<8x32xf32> to vector<8x1x32xf32>
    %9 = vector.broadcast %8 : vector<8x1x32xf32> to vector<8x16x32xf32>
    %10 = arith.addf %6, %9 : vector<8x16x32xf32>
    %11 = vector.shape_cast %10 : vector<8x16x32xf32> to vector<128x32xf32>
    %c0_6 = arith.constant 0 : index
    %c0_7 = arith.constant 0 : index
    %12 = vector.load %arg4[%c0_6, %c0_7] : memref<2x32xf32, #tpu.memory_space<vmem>>, vector<2x32xf32>
    %cst_8 = arith.constant dense<0.000000e+00> : vector<2x128xf32>
    %13 = tpu.matmul %12, %11, %cst_8 {dimension_numbers = #tpu.dot_dimension_numbers<[1], [1], [0], [0], [0, 0, 1, 0], [], []>} : vector<2x32xf32>, vector<128x32xf32>, vector<2x128xf32> -> vector<2x128xf32>
    %c0_9 = arith.constant 0 : index
    %c0_10 = arith.constant 0 : index
    %14 = vector.load %arg5[%c0_9, %c0_10] : memref<2x1xf32, #tpu.memory_space<vmem>>, vector<2x1xf32>
    %15 = vector.broadcast %14 : vector<2x1xf32> to vector<2x128xf32>
    %16 = arith.addf %13, %15 : vector<2x128xf32>
    %c0_11 = arith.constant 0 : index
    %c0_12 = arith.constant 0 : index
    %17 = vector.load %arg6[%c0_11, %c0_12] : memref<1x128xbf16, #tpu.memory_space<vmem>>, vector<1x128xbf16>
    %18 = arith.extf %17 : vector<1x128xbf16> to vector<1x128xf32>
    %19 = vector.broadcast %18 : vector<1x128xf32> to vector<2x128xf32>
    %20 = arith.mulf %16, %19 : vector<2x128xf32>
    %c0_13 = arith.constant 0 : index
    %c0_14 = arith.constant 0 : index
    %21 = vector.load %arg7[%c0_13, %c0_14] : memref<2x128xf32, #tpu.memory_space<vmem>>, vector<2x128xf32>
    tpu.vector_store %arg7[%c0_13, %c0_14], %20 {strides = array<i32>} : memref<2x128xf32, #tpu.memory_space<vmem>>, vector<2x128xf32>,
    return
  }
  func.func @transform_0(%arg0: i32) -> (i32, i32) {
    %c0_i32 = arith.constant 0 : i32
    %c0_i32_0 = arith.constant 0 : i32
    return %arg0, %c0_i32 : i32, i32
  }
  func.func @transform_1(%arg0: i32) -> (i32, i32) {
    %c0_i32 = arith.constant 0 : i32
    %c0_i32_0 = arith.constant 0 : i32
    %c0_i32_1 = arith.constant 0 : i32
    return %c0_i32, %c0_i32_0 : i32, i32
  }
  func.func @transform_2(%arg0: i32) -> (i32, i32) {
    %c0_i32 = arith.constant 0 : i32
    %c0_i32_0 = arith.constant 0 : i32
    %c0_i32_1 = arith.constant 0 : i32
    return %c0_i32, %c0_i32_0 : i32, i32
  }
  func.func @transform_3(%arg0: i32) -> (i32, i32) {
    %c0_i32 = arith.constant 0 : i32
    %c0_i32_0 = arith.constant 0 : i32
    %c0_i32_1 = arith.constant 0 : i32
    return %c0_i32, %c0_i32_0 : i32, i32
  }
  func.func @transform_4(%arg0: i32) -> (i32, i32) {
    %c0_i32 = arith.constant 0 : i32
    %c0_i32_0 = arith.constant 0 : i32
    %c0_i32_1 = arith.constant 0 : i32
    return %c0_i32, %c0_i32_0 : i32, i32
  }
  func.func @transform_5(%arg0: i32) -> (i32, i32) {
    %c0_i32 = arith.constant 0 : i32
    %c0_i32_0 = arith.constant 0 : i32
    return %c0_i32, %arg0 : i32, i32
  }
  func.func @transform_6(%arg0: i32) -> (i32, i32) {
    %c0_i32 = arith.constant 0 : i32
    %c0_i32_0 = arith.constant 0 : i32
    return %c0_i32, %arg0 : i32, i32
  }
}

</mosaic_0001>

<bundles_post_ra>
// kernel: tpu_custom_call.1
= control target key start
LH: loop header
LB: loop body
LE: loop exit
PB: predicated region body
PF: predicated region fallthrough
CT: control target
= control target key end

     0   :  { %11 = vsyncpa [#allocation3], 0  ;;  %s1294_s0 = inlined_call_operand.vmem [shape: bf16[256,16], index: 0, kind: input, shape index: {}]   ;;  %s1295_s1 = inlined_call_operand.vmem [shape: bf16[16,32], index: 1, kind: input, shape index: {}]   ;;  %s1296_s2 = inlined_call_operand.vmem [shape: f32[1,32], index: 2, kind: input, shape index: {}]   ;;  %s1297_s3 = inlined_call_operand.vmem [shape: f32[2,32], index: 3, kind: input, shape index: {}]   ;;  %s1298_s4 = inlined_call_operand.vmem [shape: f32[2,1], index: 4, kind: input, shape index: {}]   ;;  %s1299_s5 = inlined_call_operand.vmem [shape: bf16[1,256], index: 5, kind: input, shape index: {}]   ;;  %s1300_s6 = inlined_call_operand.hbm [shape: f32[2,256], index: 6, kind: output, shape index: {}]  }
   0x1   :  { %13 = vsyncpa [#allocation3 + $0x1], 0  ;;  %s1081_s21 = smov 0   ;;  %s1083_s22 = smov 0  }
   0x2   :  { %s1085_s23 = smov 0   ;;  %s1087_s24 = smov 0  }
   0x3 LB: > { %s1102_s25 = sadd.s32 4294967295, %s1039_s24   ;;  %s767_s26 = sadd.s32 4294967294, %s1039_s24   ;;  %s1039_s24 = sphi %s1087_s24, %s1308_s24   ;;  %s1035_s23 = sphi %s1085_s23, %s1307_s23   ;;  %s1031_s22 = sphi %s1083_s22, %s1306_s22   ;;  %s1027_s21 = sphi %s1081_s21, %s1305_s21  }
   0x4   : > { %s1106_s27 = sadd.s32 1, %s1039_s24   ;;  %s162_s28 = sadd.s32 1, %s1035_s23 }
   0x5   : > { %s159_s29 = ssub.s32 %s1039_s24, %s1106_s27  ;;  %p172_p0 = scmp.ne.s32.totalorder %s1035_s23, %s1031_s22 }
   0x6   : > { %p160_p1 = scmp.eq.s32.totalorder %s159_s29, 0  ;;  %p173_p2 = scmp.eq.s32.totalorder %s1102_s25, 1 }
   0x7   : > { %p178_p3 = scmp.ne.s32.totalorder %s1031_s22, %s1027_s21  ;;  %p179_p4 = scmp.eq.s32.totalorder %s767_s26, 1 }
   0x8   : > { %s1117_s30 = scalar_select %p160_p1, %s1035_s23, %s162_s28  }
   0x9   : > { %p1119_p5 = por %p173_p2, %p172_p0  ;;  %p1123_p6 = por %p179_p4, %p178_p3 }
   0xa   : > { %p770_p7 = scmp.ge.s32.totalorder %s1039_s24, 1  ;;  %p224_p8 = scmp.lt.s32.totalorder %s1039_s24, 3 }
   0xc   : > { %p225_p9 = pnand %p770_p7, %p224_p8 }
   0xd   : > { %v968_v0 = vld [vmem:[%s1295_s1] sm:$0xff] (!%p225_p9)   ;;  %s772_s11 = sshll.u32 (!%p225_p9), %s1102_s25, 4  ;;  %vm338_vm0 = vcmask (!%p225_p9), 130048   ;;  %v1041_v9 = vmov (!%p225_p9), 0.0|0.0   ;;  %vm1042_vm1 = vmmov (!%p225_p9), 0   ;;  %v1043_v10 = vmov (!%p225_p9), 0.0  }
   0xe   : > { %228 = sbr.rel (%p225_p9) target bundleno = 556 (0x22c), region = 44  ;;  %p258_p10 = scmp.lt.s32.totalorder (!%p225_p9), %s772_s11, 31  ;;  %839 = vmatprep.subr.bf16.mxu0 (!%p225_p9), %v968_v0  ;;  %892 = vmatprep.subr.bf16.mxu1 (!%p225_p9), %v1041_v9  ;;  %v550_v11 = vld [vmem:[%s1298_s4] sm:$0x3] (!%p225_p9)  ;;  %v1044_v12 = vmov (!%p225_p9), 0   ;;  %vm460_vm2 = vcmask (!%p225_p9), 261120  }
   0xf   : > { %840 = vmatpush3.bf16.msra.mxu0 (!%p225_p9), %v968_v0  ;;  %889 = vmatprep.mubr.msk.f32.mxu1 (!%p225_p9), %vm1042_vm1, %v1043_v10  ;;  %v1151_v13 = vld [vmem:[%s1296_s2] ss:$0 sm:$0xff] (!%p225_p9)  ;;  %vm1197_vm3 = vmpackc.low (!%p225_p9), %vm460_vm2, %vm460_vm2  ;;  %p263_p11 = scmp.lt.s32.totalorder (!%p225_p9), %s1102_s25, 1  ;;  %s810_s13 = sshll.u32 (!%p225_p9), %s1102_s25, 5 }
  0x10   : > { %967 = vset.pattern.permute.xlu0 (!%p225_p9), %v1044_v12  ;;  %s1252_s18 = scalar_lea.hbm (!%p225_p9), %s1300_s6, %s810_s13 }
  0x11   : > { %553 = vperm.xlu0 (!%p225_p9), %967, %v550_v11  }
  0x15   : > { %s1310_s11 = smov (!%p258_p10, %s772_s11), 31 }
  0x16   : > { %s773_s12 = sshll.u32 %s1310_s11, 2  ;;  %s254_s11 = sand.u32 1, %s1031_s22  }
  0x17   : > { %s261_s15 = scalar_lea.vmem %s1294_s0, %s773_s12  ;;  %s771_s12 = sshll.u32 %s254_s11, 1 }
  0x18   : > { %v969_v1 = vld [vmem:[%s261_s15] sm:$0xff]   ;;  %v970_v2 = vld [vmem:[%s261_s15 + $0x8] sm:$0xff]   ;;  %v971_v3 = vld [vmem:[%s261_s15 + $0x10] sm:$0xff]   ;;  %s264_s28 = scalar_select %p263_p11, %s1102_s25, 1 }
  0x19   : > { %841 = vmatprep.mubr.msk.bf16.mxu0 %vm338_vm0, %v969_v1  ;;  %v972_v4 = vld [vmem:[%s261_s15 + $0x18] sm:$0xff]   ;;  %v973_v5 = vld [vmem:[%s261_s15 + $0x20] sm:$0xff]   ;;  %v974_v6 = vld [vmem:[%s261_s15 + $0x28] sm:$0xff]   ;;  %s256_s14 = scalar_lea.vmem [#allocation2], %s771_s12  ;;  %s686_s19 = scalar_lea.sflag [#allocation3], %s254_s11 }
  0x1a   : > { %842 = vmatmul.mubr.msk.bf16.vlgmr.msra.gmra.mrb[0].mxu0 %vm338_vm0, %v970_v2  ;;  %v975_v7 = vld [vmem:[%s261_s15 + $0x30] sm:$0xff]   ;;  %v976_v8 = vld [vmem:[%s261_s15 + $0x38] sm:$0xff]   ;;  %s265_s10 = scalar_lea.vmem %s1299_s5, %s264_s28  ;;  %s699_s15 = sshll.u32 %s256_s14, 4  ;;  %s1254_s15 = int_to_ptr.vmem [resolvable:$true] %s699_s15 }
  0x1b   : > { %845 = vmatprep.mubr.msk.bf16.mxu0 %vm338_vm0, %v971_v3  ;;  %s977_s20 = scalar_lea.vmem %s1254_s15, 32  ;;  %s1045_s25 = smov [#allocation2]  }
  0x1c   : > { %p978_p12 = scmp.ne.s32.totalorder %s1254_s15, %s977_s20  ;;  %s981_s26 = sshll.u32 %s1045_s25, 4  ;;  %s982_s26 = int_to_ptr.vmem [resolvable:$false] %s981_s26 }
  0x1d   : > { %s983_s28 = scalar_lea.vmem %s982_s26, 64  ;;  %p984_p1 = scmp.lt.s32.totalorder %s1254_s15, %s982_s26 }
  0x1e   : > { %p979_p13 = pnand %p978_p12, %p1119_p5  ;;  %p985_p2 = scmp.lt.s32.totalorder %s983_s28, %s977_s20 }
  0x20   : > { %p980_p0 = pneg %p979_p13  ;;  %p986_p3 = por %p985_p2, %p984_p1 }
  0x22   : > { %846 = vmatmul.mubr.msk.bf16.gmra.mrb[4].mxu0 %vm338_vm0, %v972_v4  ;;  %p987_p4 = pnand %p986_p3, %p980_p0 }
  0x23   : > { %849 = vmatprep.mubr.msk.bf16.mxu0 %vm338_vm0, %v973_v5 }
  0x2a   : > { %850 = vmatmul.mubr.msk.bf16.gmra.mrb[8].mxu0 %vm338_vm0, %v974_v6 }
  0x2b   : > { %853 = vmatprep.mubr.msk.bf16.mxu0 %vm338_vm0, %v975_v7 }
  0x32   : > { %854 = vmatmul.mubr.msk.bf16.gmra.mrb[12].mxu0 %vm338_vm0, %v976_v8 }
  0xed   : > { %v843_v14 = vpop.f32.mrb[0].mxu0 }
  0xee   : > { %v406_v15 = vadd.f32 %v843_v14, %v1151_v13  ;;  %v397_v16 = vpop.f32.mrb[1].mxu0 }
  0xef   : > { %v398_v17 = vadd.f32 %v1151_v13, %v397_v16  ;;  %v844_v18 = vpop.f32.mrb[2].mxu0 }
  0xf0   : > { %v409_v19 = vadd.f32 %v844_v18, %v1151_v13  ;;  %v400_v20 = vpop.f32.mrb[3].mxu0  ;;  %v470_v22 = vsel %vm460_vm2, %v406_v15, -inf }
  0xf1   : > { %v401_v21 = vadd.f32 %v1151_v13, %v400_v20  ;;  %v461_v24 = vsel %vm460_vm2, %v398_v17, -inf }
  0xf2   : > { %v471_v23 = vsel %vm460_vm2, %v409_v19, -inf }
  0xf3   : > { %v472_v25 = vmax.f32 %v470_v22, %v471_v23  ;;  %v462_v26 = vsel %vm460_vm2, %v401_v21, -inf }
  0xf4   : > { %v463_v27 = vmax.f32 %v461_v24, %v462_v26 }
  0xf5   : > { %v473_v28 = vrot.slane %v472_v25, 4  ;;  %v847_v29 = vpop.f32.mrb[4].mxu0 }
  0xf6   : > { %v464_v30 = vrot.slane %v463_v27, 4  ;;  %v1162_v31 = vadd.f32 %v847_v29, %v1151_v13  ;;  %v413_v32 = vpop.f32.mrb[5].mxu0 }
  0xf7   : > { %v474_v33 = vmax.f32 %v472_v25, %v473_v28  ;;  %v1165_v34 = vadd.f32 %v1151_v13, %v413_v32  ;;  %v848_v35 = vpop.f32.mrb[6].mxu0 }
  0xf8   : > { %v465_v36 = vmax.f32 %v463_v27, %v464_v30  ;;  %v488_v37 = vsel %vm460_vm2, %v1162_v31, -inf  ;;  %v1170_v38 = vadd.f32 %v848_v35, %v1151_v13  ;;  %v416_v39 = vpop.f32.mrb[7].mxu0 }
  0xf9   : > { %v475_v40 = vrot.slane %v474_v33, 2  ;;  %v479_v41 = vsel %vm460_vm2, %v1165_v34, -inf  ;;  %v1175_v42 = vadd.f32 %v1151_v13, %v416_v39 }
  0xfa   : > { %v466_v43 = vrot.slane %v465_v36, 2  ;;  %v489_v44 = vsel %vm460_vm2, %v1170_v38, -inf }
  0xfb   : > { %v476_v45 = vmax.f32 %v474_v33, %v475_v40  ;;  %v490_v46 = vmax.f32 %v488_v37, %v489_v44  ;;  %v480_v47 = vsel %vm460_vm2, %v1175_v42, -inf }
  0xfc   : > { %v467_v48 = vmax.f32 %v465_v36, %v466_v43  ;;  %v481_v49 = vmax.f32 %v479_v41, %v480_v47 }
  0xfd   : > { %v477_v50 = vrot.slane %v476_v45, 1  ;;  %v491_v51 = vrot.slane %v490_v46, 4  ;;  %v851_v52 = vpop.f32.mrb[8].mxu0 }
  0xfe   : > { %v468_v53 = vrot.slane %v467_v48, 1  ;;  %v482_v54 = vrot.slane %v481_v49, 4  ;;  %v1182_v55 = vadd.f32 %v851_v52, %v1151_v13  ;;  %v429_v56 = vpop.f32.mrb[9].mxu0 }
  0xff   : > { %v478_v57 = vmax.f32 %v476_v45, %v477_v50  ;;  %v492_v58 = vmax.f32 %v490_v46, %v491_v51  ;;  %v1185_v59 = vadd.f32 %v1151_v13, %v429_v56  ;;  %v852_v60 = vpop.f32.mrb[10].mxu0 }
 0x100   : > { %v469_v61 = vmax.f32 %v467_v48, %v468_v53  ;;  %v483_v62 = vmax.f32 %v481_v49, %v482_v54  ;;  %v506_v63 = vsel %vm460_vm2, %v1182_v55, -inf  ;;  %v441_v0 = vadd.f32 %v852_v60, %v1151_v13  ;;  %v432_v1 = vpop.f32.mrb[11].mxu0 }
 0x101   : > { %v535_v2 = vadd.f32 %v478_v57, %v406_v15  ;;  %v536_v3 = vadd.f32 %v478_v57, %v409_v19  ;;  %v493_v4 = vrot.slane %v492_v58, 2  ;;  %v497_v5 = vsel %vm460_vm2, %v1185_v59, -inf }
 0x102   : > { %v534_v6 = vadd.f32 %v469_v61, %v401_v21  ;;  %v484_v7 = vrot.slane %v483_v62, 2  ;;  %v507_v8 = vsel %vm460_vm2, %v441_v0, -inf  ;;  %v433_v10 = vadd.f32 %v1151_v13, %v432_v1 }
 0x103   : > { %v897_v11 = vpack.c.bf16 %v536_v3, %v535_v2  ;;  %v494_v12 = vmax.f32 %v492_v58, %v493_v4  ;;  %v508_v14 = vmax.f32 %v506_v63, %v507_v8  ;;  %v533_v16 = vadd.f32 %v469_v61, %v398_v17 }
 0x104   : > { %v485_v18 = vmax.f32 %v483_v62, %v484_v7  ;;  %v498_v20 = vsel %vm460_vm2, %v433_v10, -inf }
 0x105   : > { %v495_v19 = vrot.slane %v494_v12, 1  ;;  %v509_v21 = vrot.slane %v508_v14, 4  ;;  %v499_v22 = vmax.f32 %v497_v5, %v498_v20  ;;  %v893_v23 = vpack.c.bf16 %v534_v6, %v533_v16  ;;  %v855_v24 = vpop.f32.mrb[12].mxu0 }
 0x106   : > { %v486_v25 = vrot.slane %v485_v18, 1  ;;  %v454_v26 = vadd.f32 %v855_v24, %v1151_v13  ;;  %v445_v27 = vpop.f32.mrb[13].mxu0  ;;  %v554_v24 = vpop.permute.xlu0 %553 }
 0x107   : > { %v496_v28 = vmax.f32 %v494_v12, %v495_v19  ;;  %v510_v17 = vmax.f32 %v508_v14, %v509_v21  ;;  %v500_v29 = vrot.slane %v499_v22, 4  ;;  %895 = vmatpush3.bf16.xpose.msk.msra.mxu1 %vm1197_vm3, %v893_v23  ;;  %v856_v30 = vpop.f32.mrb[14].mxu0  ;;  %v446_v35 = vadd.f32 %v1151_v13, %v445_v27  ;;  %v549_v19 = vld [vmem:[%s1297_s3] sm:$0x3] }
 0x108   : > { %v487_v32 = vmax.f32 %v485_v18, %v486_v25  ;;  %v524_v33 = vsel %vm460_vm2, %v454_v26, -inf  ;;  %v457_v36 = vadd.f32 %v856_v30, %v1151_v13  ;;  %896 = vmatprep.subr.bf16.mxu1 %v1041_v9  ;;  %v448_v37 = vpop.f32.mrb[15].mxu0  ;;  %v679_v21 = vlaneseq }
 0x109   : > { %v539_v39 = vadd.f32 %v496_v28, %v1162_v31  ;;  %v540_v40 = vadd.f32 %v496_v28, %v1170_v38  ;;  %v511_v41 = vrot.slane %v510_v17, 2  ;;  %v501_v43 = vmax.f32 %v499_v22, %v500_v29 }
 0x10a   : > { %v537_v44 = vadd.f32 %v487_v32, %v1165_v34  ;;  %v538_v45 = vadd.f32 %v487_v32, %v1175_v42  ;;  %v525_v46 = vsel %vm460_vm2, %v457_v36, -inf  ;;  %v515_v52 = vsel %vm460_vm2, %v446_v35, -inf }
 0x10b   : > { %v905_v47 = vpack.c.bf16 %v540_v40, %v539_v39  ;;  %v512_v48 = vmax.f32 %v510_v17, %v511_v41  ;;  %v502_v49 = vrot.slane %v501_v43, 2  ;;  %v526_v50 = vmax.f32 %v524_v33, %v525_v46 }
 0x10c   : > { %v901_v51 = vpack.c.bf16 %v538_v45, %v537_v44  ;;  %v449_v53 = vadd.f32 %v1151_v13, %v448_v37  ;;  %v680_v22 = vshrl.u32 %v679_v21, 7 }
 0x10d   : > { %v513_v31 = vrot.slane %v512_v48, 1  ;;  %v503_v54 = vmax.f32 %v501_v43, %v502_v49  ;;  %v527_v38 = vrot.slane %v526_v50, 4 }
 0x10e   : > { %v516_v56 = vsel %vm460_vm2, %v449_v53, -inf  ;;  %v681_v23 = vsub.s32 0, %v680_v22 }
 0x10f   : > { %v514_v57 = vmax.f32 %v512_v48, %v513_v31  ;;  %v504_v34 = vrot.slane %v503_v54, 1  ;;  %v528_v58 = vmax.f32 %v526_v50, %v527_v38  ;;  %v517_v42 = vmax.f32 %v515_v52, %v516_v56  ;;  %899 = vmatpush3.bf16.xpose.msk.msra.mxu1 %vm1197_vm3, %v897_v11 }
 0x110   : > { %900 = vmatprep.subr.bf16.mxu1 %v1041_v9 }
 0x111   : > { %v543_v60 = vadd.f32 %v514_v57, %v1182_v55  ;;  %v544_v61 = vadd.f32 %v514_v57, %v441_v0  ;;  %v505_v62 = vmax.f32 %v503_v54, %v504_v34  ;;  %v529_v63 = vrot.slane %v528_v58, 2 }
 0x112   : > { %v518_v13 = vrot.slane %v517_v42, 4 }
 0x113   : > { %v913_v1 = vpack.c.bf16 %v544_v61, %v543_v60  ;;  %v541_v2 = vadd.f32 %v505_v62, %v1185_v59  ;;  %v542_v3 = vadd.f32 %v505_v62, %v433_v10  ;;  %v530_v4 = vmax.f32 %v528_v58, %v529_v63 }
 0x114   : > { %v519_v5 = vmax.f32 %v517_v42, %v518_v13 }
 0x115   : > { %v909_v6 = vpack.c.bf16 %v542_v3, %v541_v2  ;;  %v531_v7 = vrot.slane %v530_v4, 1 }
 0x116   : > { %v520_v8 = vrot.slane %v519_v5, 2 }
 0x117   : > { %v532_v12 = vmax.f32 %v530_v4, %v531_v7  ;;  %903 = vmatpush3.bf16.xpose.msk.msra.mxu1 %vm1197_vm3, %v901_v51 }
 0x118   : > { %v521_v11 = vmax.f32 %v519_v5, %v520_v8  ;;  %904 = vmatprep.subr.bf16.mxu1 %v1041_v9 }
 0x119   : > { %v547_v55 = vadd.f32 %v532_v12, %v454_v26  ;;  %v548_v0 = vadd.f32 %v532_v12, %v457_v36 }
 0x11a   : > { %v522_v14 = vrot.slane %v521_v11, 1 }
 0x11b   : > { %v921_v16 = vpack.c.bf16 %v548_v0, %v547_v55 }
 0x11c   : > { %v523_v18 = vmax.f32 %v521_v11, %v522_v14 }
 0x11e   : > { %v545_v59 = vadd.f32 %v523_v18, %v446_v35  ;;  %v546_v10 = vadd.f32 %v523_v18, %v449_v53 }
 0x11f   : > { %907 = vmatpush3.bf16.xpose.msk.msra.mxu1 %vm1197_vm3, %v905_v47 }
 0x120   : > { %v917_v20 = vpack.c.bf16 %v546_v10, %v545_v59  ;;  %908 = vmatprep.subr.bf16.mxu1 %v1041_v9 }
 0x127   : > { %911 = vmatpush3.bf16.xpose.msk.msra.mxu1 %vm1197_vm3, %v909_v6 }
 0x128   : > { %912 = vmatprep.subr.bf16.mxu1 %v1041_v9 }
 0x12f   : > { %915 = vmatpush3.bf16.xpose.msk.msra.mxu1 %vm1197_vm3, %v913_v1 }
 0x130   : > { %916 = vmatprep.subr.bf16.mxu1 %v1041_v9 }
 0x137   : > { %919 = vmatpush3.bf16.xpose.msk.msra.mxu1 %vm1197_vm3, %v917_v20 }
 0x138   : > { %920 = vmatprep.subr.bf16.mxu1 %v1041_v9  ;;  %v677_v9 = vld [vmem:[%s265_s10] sm:$0x1] }
 0x139   : > { %v678_v15 = vunpack.c.l.bf16 %v677_v9 }
 0x13b   : > { %v682_v25 = vrot.slane %v678_v15, %v681_v23 }
 0x13f   : > { %923 = vmatpush3.bf16.xpose.msk.msra.mxu1 %vm1197_vm3, %v921_v16 }
 0x146   : > { %890 = vmatmul.mubr.msk.f32.vlgmr.msra.gmra.mrb[0].mxu1 %vm460_vm2, %v549_v19 }
 0x219   : > { %v673_v26 = vpop.f32.mrb[0].mxu1 }
 0x21a   : > { %v674_v27 = vadd.f32 %v673_v26, %v554_v24  ;;  %v891_v28 = vpop.f32.mrb[1].mxu1 }
 0x21c   : > { %v683_v17 = vmul.f32 %v682_v25, %v674_v27 }
 0x21e   : > { %684 = vst [vmem:[%s256_s14] sm:$0x3] %v683_v17 }
 0x21f   : > { %990 = shalt.err (!%p987_p4)
}
 0x220   : > { %s991_s29 = scalar_lea.hbm %s1252_s18, 32  ;;  %s995_s11 = scalar_lea.hbm %s1300_s6, 64 }
 0x221   : > { %p992_p7 = scmp.ne.s32.totalorder %s1252_s18, %s991_s29  ;;  %p996_p10 = scmp.lt.u32.totalorder %s1252_s18, %s1300_s6 }
 0x222   : > { %p997_p11 = scmp.lt.u32.totalorder %s995_s11, %s991_s29  ;;  %p999_p13 = scmp.lt.u32.totalorder %s991_s29, %s1252_s18 }
 0x223   : > { %p993_p8 = pnand %p992_p7, %p1119_p5 }
 0x224   : > { %p998_p12 = por %p997_p11, %p996_p10 }
 0x225   : > { %p994_p9 = pneg %p993_p8 }
 0x226   : > { %p1000_p0 = por %p999_p13, %p998_p12 }
 0x228   : > { %p1001_p1 = pnand %p1000_p0, %p994_p9 }
 0x22a   : > { %1004 = shalt.err (!%p1001_p1)
}
 0x22b   : > { %924 = dma.vmem_to_hbm [thread:$0]  (%p1119_p5), %s1254_s15, 32, %s1252_s18, %s686_s19  }
 0x22c PF: > { %p930_p2 = scmp.ge.s32.totalorder %s1039_s24, 2  ;;  %s711_s14 = sand.u32 1, %s1027_s21  }
 0x22d   : > { %s712_s16 = scalar_lea.sflag [#allocation3], %s711_s14 }
 0x22e   : > { %p927_p3 = pnand %p930_p2, %p1123_p6 }
 0x230   : > { %1022 = dma.done.wait (!%p927_p3), %s712_s16, 32  }
 0x231   : > { %1024 = vsyncadd (!%p927_p3), %s712_s16, 4294967264  ;;  %p16_p4 = scmp.ge.s32.totalorder %s1106_s27, 4   ;;  %s1305_s21 = smov %s1031_s22 }
 0x232   : > { %s1306_s22 = smov %s1035_s23  ;;  %s1307_s23 = smov %s1117_s30 }
 0x233   : > { %s1308_s24 = smov %s1106_s27  ;;  %18 = sbr.rel (!%p16_p4) target bundleno = 3 (0x3), region = 82 }
 0x23a   :  { %717 = vsyncpa [#allocation3], 1 }
 0x23b   :  { %719 = vsyncpa [#allocation3 + $0x1], 1 }

// kernel: tpu_custom_call.1
= control target key start
LH: loop header
LB: loop body
LE: loop exit
PB: predicated region body
PF: predicated region fallthrough
CT: control target
= control target key end

     0   :  { %11 = vsyncpa [#allocation3], 0  ;;  %s1294_s0 = inlined_call_operand.vmem [shape: bf16[256,16], index: 0, kind: input, shape index: {}]   ;;  %s1295_s1 = inlined_call_operand.vmem [shape: bf16[16,32], index: 1, kind: input, shape index: {}]   ;;  %s1296_s2 = inlined_call_operand.vmem [shape: f32[1,32], index: 2, kind: input, shape index: {}]   ;;  %s1297_s3 = inlined_call_operand.vmem [shape: f32[2,32], index: 3, kind: input, shape index: {}]   ;;  %s1298_s4 = inlined_call_operand.vmem [shape: f32[2,1], index: 4, kind: input, shape index: {}]   ;;  %s1299_s5 = inlined_call_operand.vmem [shape: bf16[1,256], index: 5, kind: input, shape index: {}]   ;;  %s1300_s6 = inlined_call_operand.hbm [shape: f32[2,256], index: 6, kind: output, shape index: {}]  }
   0x1   :  { %13 = vsyncpa [#allocation3 + $0x1], 0  ;;  %s1081_s21 = smov 0   ;;  %s1083_s22 = smov 0  }
   0x2   :  { %s1085_s23 = smov 0   ;;  %s1087_s24 = smov 0  }
   0x3 LB: > { %s1102_s25 = sadd.s32 4294967295, %s1039_s24   ;;  %s767_s26 = sadd.s32 4294967294, %s1039_s24   ;;  %s1039_s24 = sphi %s1087_s24, %s1308_s24   ;;  %s1035_s23 = sphi %s1085_s23, %s1307_s23   ;;  %s1031_s22 = sphi %s1083_s22, %s1306_s22   ;;  %s1027_s21 = sphi %s1081_s21, %s1305_s21  }
   0x4   : > { %s1106_s27 = sadd.s32 1, %s1039_s24   ;;  %s162_s28 = sadd.s32 1, %s1035_s23 }
   0x5   : > { %s159_s29 = ssub.s32 %s1039_s24, %s1106_s27  ;;  %p172_p0 = scmp.ne.s32.totalorder %s1035_s23, %s1031_s22 }
   0x6   : > { %p160_p1 = scmp.eq.s32.totalorder %s159_s29, 0  ;;  %p173_p2 = scmp.eq.s32.totalorder %s1102_s25, 1 }
   0x7   : > { %p178_p3 = scmp.ne.s32.totalorder %s1031_s22, %s1027_s21  ;;  %p179_p4 = scmp.eq.s32.totalorder %s767_s26, 1 }
   0x8   : > { %s1117_s30 = scalar_select %p160_p1, %s1035_s23, %s162_s28  }
   0x9   : > { %p1119_p5 = por %p173_p2, %p172_p0  ;;  %p1123_p6 = por %p179_p4, %p178_p3 }
   0xa   : > { %p770_p7 = scmp.ge.s32.totalorder %s1039_s24, 1  ;;  %p224_p8 = scmp.lt.s32.totalorder %s1039_s24, 3 }
   0xc   : > { %p225_p9 = pnand %p770_p7, %p224_p8 }
   0xd   : > { %v968_v0 = vld [vmem:[%s1295_s1] sm:$0xff] (!%p225_p9)   ;;  %s772_s11 = sshll.u32 (!%p225_p9), %s1102_s25, 4  ;;  %vm338_vm0 = vcmask (!%p225_p9), 130048   ;;  %v1041_v9 = vmov (!%p225_p9), 0.0|0.0   ;;  %vm1042_vm1 = vmmov (!%p225_p9), 0   ;;  %v1043_v10 = vmov (!%p225_p9), 0.0  }
   0xe   : > { %228 = sbr.rel (%p225_p9) target bundleno = 556 (0x22c), region = 44  ;;  %p258_p10 = scmp.lt.s32.totalorder (!%p225_p9), %s772_s11, 31  ;;  %839 = vmatprep.subr.bf16.mxu0 (!%p225_p9), %v968_v0  ;;  %892 = vmatprep.subr.bf16.mxu1 (!%p225_p9), %v1041_v9  ;;  %v550_v11 = vld [vmem:[%s1298_s4] sm:$0x3] (!%p225_p9)  ;;  %v1044_v12 = vmov (!%p225_p9), 0   ;;  %vm460_vm2 = vcmask (!%p225_p9), 261120  }
   0xf   : > { %840 = vmatpush3.bf16.msra.mxu0 (!%p225_p9), %v968_v0  ;;  %889 = vmatprep.mubr.msk.f32.mxu1 (!%p225_p9), %vm1042_vm1, %v1043_v10  ;;  %v1151_v13 = vld [vmem:[%s1296_s2] ss:$0 sm:$0xff] (!%p225_p9)  ;;  %vm1197_vm3 = vmpackc.low (!%p225_p9), %vm460_vm2, %vm460_vm2  ;;  %p263_p11 = scmp.lt.s32.totalorder (!%p225_p9), %s1102_s25, 1  ;;  %s810_s13 = sshll.u32 (!%p225_p9), %s1102_s25, 5 }
  0x10   : > { %967 = vset.pattern.permute.xlu0 (!%p225_p9), %v1044_v12  ;;  %s1252_s18 = scalar_lea.hbm (!%p225_p9), %s1300_s6, %s810_s13 }
  0x11   : > { %553 = vperm.xlu0 (!%p225_p9), %967, %v550_v11  }
  0x15   : > { %s1310_s11 = smov (!%p258_p10, %s772_s11), 31 }
  0x16   : > { %s773_s12 = sshll.u32 %s1310_s11, 2  ;;  %s254_s11 = sand.u32 1, %s1031_s22  }
  0x17   : > { %s261_s15 = scalar_lea.vmem %s1294_s0, %s773_s12  ;;  %s771_s12 = sshll.u32 %s254_s11, 1 }
  0x18   : > { %v969_v1 = vld [vmem:[%s261_s15] sm:$0xff]   ;;  %v970_v2 = vld [vmem:[%s261_s15 + $0x8] sm:$0xff]   ;;  %v971_v3 = vld [vmem:[%s261_s15 + $0x10] sm:$0xff]   ;;  %s264_s28 = scalar_select %p263_p11, %s1102_s25, 1 }
  0x19   : > { %841 = vmatprep.mubr.msk.bf16.mxu0 %vm338_vm0, %v969_v1  ;;  %v972_v4 = vld [vmem:[%s261_s15 + $0x18] sm:$0xff]   ;;  %v973_v5 = vld [vmem:[%s261_s15 + $0x20] sm:$0xff]   ;;  %v974_v6 = vld [vmem:[%s261_s15 + $0x28] sm:$0xff]   ;;  %s256_s14 = scalar_lea.vmem [#allocation2], %s771_s12  ;;  %s686_s19 = scalar_lea.sflag [#allocation3], %s254_s11 }
  0x1a   : > { %842 = vmatmul.mubr.msk.bf16.vlgmr.msra.gmra.mrb[0].mxu0 %vm338_vm0, %v970_v2  ;;  %v975_v7 = vld [vmem:[%s261_s15 + $0x30] sm:$0xff]   ;;  %v976_v8 = vld [vmem:[%s261_s15 + $0x38] sm:$0xff]   ;;  %s265_s10 = scalar_lea.vmem %s1299_s5, %s264_s28  ;;  %s699_s15 = sshll.u32 %s256_s14, 4  ;;  %s1254_s15 = int_to_ptr.vmem [resolvable:$true] %s699_s15 }
  0x1b   : > { %845 = vmatprep.mubr.msk.bf16.mxu0 %vm338_vm0, %v971_v3  ;;  %s977_s20 = scalar_lea.vmem %s1254_s15, 32  ;;  %s1045_s25 = smov [#allocation2]  }
  0x1c   : > { %p978_p12 = scmp.ne.s32.totalorder %s1254_s15, %s977_s20  ;;  %s981_s26 = sshll.u32 %s1045_s25, 4  ;;  %s982_s26 = int_to_ptr.vmem [resolvable:$false] %s981_s26 }
  0x1d   : > { %s983_s28 = scalar_lea.vmem %s982_s26, 64  ;;  %p984_p1 = scmp.lt.s32.totalorder %s1254_s15, %s982_s26 }
  0x1e   : > { %p979_p13 = pnand %p978_p12, %p1119_p5  ;;  %p985_p2 = scmp.lt.s32.totalorder %s983_s28, %s977_s20 }
  0x20   : > { %p980_p0 = pneg %p979_p13  ;;  %p986_p3 = por %p985_p2, %p984_p1 }
  0x22   : > { %846 = vmatmul.mubr.msk.bf16.gmra.mrb[4].mxu0 %vm338_vm0, %v972_v4  ;;  %p987_p4 = pnand %p986_p3, %p980_p0 }
  0x23   : > { %849 = vmatprep.mubr.msk.bf16.mxu0 %vm338_vm0, %v973_v5 }
  0x2a   : > { %850 = vmatmul.mubr.msk.bf16.gmra.mrb[8].mxu0 %vm338_vm0, %v974_v6 }
  0x2b   : > { %853 = vmatprep.mubr.msk.bf16.mxu0 %vm338_vm0, %v975_v7 }
  0x32   : > { %854 = vmatmul.mubr.msk.bf16.gmra.mrb[12].mxu0 %vm338_vm0, %v976_v8 }
  0xed   : > { %v843_v14 = vpop.f32.mrb[0].mxu0 }
  0xee   : > { %v406_v15 = vadd.f32 %v843_v14, %v1151_v13  ;;  %v397_v16 = vpop.f32.mrb[1].mxu0 }
  0xef   : > { %v398_v17 = vadd.f32 %v1151_v13, %v397_v16  ;;  %v844_v18 = vpop.f32.mrb[2].mxu0 }
  0xf0   : > { %v409_v19 = vadd.f32 %v844_v18, %v1151_v13  ;;  %v400_v20 = vpop.f32.mrb[3].mxu0  ;;  %v470_v22 = vsel %vm460_vm2, %v406_v15, -inf }
  0xf1   : > { %v401_v21 = vadd.f32 %v1151_v13, %v400_v20  ;;  %v461_v24 = vsel %vm460_vm2, %v398_v17, -inf }
  0xf2   : > { %v471_v23 = vsel %vm460_vm2, %v409_v19, -inf }
  0xf3   : > { %v472_v25 = vmax.f32 %v470_v22, %v471_v23  ;;  %v462_v26 = vsel %vm460_vm2, %v401_v21, -inf }
  0xf4   : > { %v463_v27 = vmax.f32 %v461_v24, %v462_v26 }
  0xf5   : > { %v473_v28 = vrot.slane %v472_v25, 4  ;;  %v847_v29 = vpop.f32.mrb[4].mxu0 }
  0xf6   : > { %v464_v30 = vrot.slane %v463_v27, 4  ;;  %v1162_v31 = vadd.f32 %v847_v29, %v1151_v13  ;;  %v413_v32 = vpop.f32.mrb[5].mxu0 }
  0xf7   : > { %v474_v33 = vmax.f32 %v472_v25, %v473_v28  ;;  %v1165_v34 = vadd.f32 %v1151_v13, %v413_v32  ;;  %v848_v35 = vpop.f32.mrb[6].mxu0 }
  0xf8   : > { %v465_v36 = vmax.f32 %v463_v27, %v464_v30  ;;  %v488_v37 = vsel %vm460_vm2, %v1162_v31, -inf  ;;  %v1170_v38 = vadd.f32 %v848_v35, %v1151_v13  ;;  %v416_v39 = vpop.f32.mrb[7].mxu0 }
  0xf9   : > { %v475_v40 = vrot.slane %v474_v33, 2  ;;  %v479_v41 = vsel %vm460_vm2, %v1165_v34, -inf  ;;  %v1175_v42 = vadd.f32 %v1151_v13, %v416_v39 }
  0xfa   : > { %v466_v43 = vrot.slane %v465_v36, 2  ;;  %v489_v44 = vsel %vm460_vm2, %v1170_v38, -inf }
  0xfb   : > { %v476_v45 = vmax.f32 %v474_v33, %v475_v40  ;;  %v490_v46 = vmax.f32 %v488_v37, %v489_v44  ;;  %v480_v47 = vsel %vm460_vm2, %v1175_v42, -inf }
  0xfc   : > { %v467_v48 = vmax.f32 %v465_v36, %v466_v43  ;;  %v481_v49 = vmax.f32 %v479_v41, %v480_v47 }
  0xfd   : > { %v477_v50 = vrot.slane %v476_v45, 1  ;;  %v491_v51 = vrot.slane %v490_v46, 4  ;;  %v851_v52 = vpop.f32.mrb[8].mxu0 }
  0xfe   : > { %v468_v53 = vrot.slane %v467_v48, 1  ;;  %v482_v54 = vrot.slane %v481_v49, 4  ;;  %v1182_v55 = vadd.f32 %v851_v52, %v1151_v13  ;;  %v429_v56 = vpop.f32.mrb[9].mxu0 }
  0xff   : > { %v478_v57 = vmax.f32 %v476_v45, %v477_v50  ;;  %v492_v58 = vmax.f32 %v490_v46, %v491_v51  ;;  %v1185_v59 = vadd.f32 %v1151_v13, %v429_v56  ;;  %v852_v60 = vpop.f32.mrb[10].mxu0 }
 0x100   : > { %v469_v61 = vmax.f32 %v467_v48, %v468_v53  ;;  %v483_v62 = vmax.f32 %v481_v49, %v482_v54  ;;  %v506_v63 = vsel %vm460_vm2, %v1182_v55, -inf  ;;  %v441_v0 = vadd.f32 %v852_v60, %v1151_v13  ;;  %v432_v1 = vpop.f32.mrb[11].mxu0 }
 0x101   : > { %v535_v2 = vadd.f32 %v478_v57, %v406_v15  ;;  %v536_v3 = vadd.f32 %v478_v57, %v409_v19  ;;  %v493_v4 = vrot.slane %v492_v58, 2  ;;  %v497_v5 = vsel %vm460_vm2, %v1185_v59, -inf }
 0x102   : > { %v534_v6 = vadd.f32 %v469_v61, %v401_v21  ;;  %v484_v7 = vrot.slane %v483_v62, 2  ;;  %v507_v8 = vsel %vm460_vm2, %v441_v0, -inf  ;;  %v433_v10 = vadd.f32 %v1151_v13, %v432_v1 }
 0x103   : > { %v897_v11 = vpack.c.bf16 %v536_v3, %v535_v2  ;;  %v494_v12 = vmax.f32 %v492_v58, %v493_v4  ;;  %v508_v14 = vmax.f32 %v506_v63, %v507_v8  ;;  %v533_v16 = vadd.f32 %v469_v61, %v398_v17 }
 0x104   : > { %v485_v18 = vmax.f32 %v483_v62, %v484_v7  ;;  %v498_v20 = vsel %vm460_vm2, %v433_v10, -inf }
 0x105   : > { %v495_v19 = vrot.slane %v494_v12, 1  ;;  %v509_v21 = vrot.slane %v508_v14, 4  ;;  %v499_v22 = vmax.f32 %v497_v5, %v498_v20  ;;  %v893_v23 = vpack.c.bf16 %v534_v6, %v533_v16  ;;  %v855_v24 = vpop.f32.mrb[12].mxu0 }
 0x106   : > { %v486_v25 = vrot.slane %v485_v18, 1  ;;  %v454_v26 = vadd.f32 %v855_v24, %v1151_v13  ;;  %v445_v27 = vpop.f32.mrb[13].mxu0  ;;  %v554_v24 = vpop.permute.xlu0 %553 }
 0x107   : > { %v496_v28 = vmax.f32 %v494_v12, %v495_v19  ;;  %v510_v17 = vmax.f32 %v508_v14, %v509_v21  ;;  %v500_v29 = vrot.slane %v499_v22, 4  ;;  %895 = vmatpush3.bf16.xpose.msk.msra.mxu1 %vm1197_vm3, %v893_v23  ;;  %v856_v30 = vpop.f32.mrb[14].mxu0  ;;  %v446_v35 = vadd.f32 %v1151_v13, %v445_v27  ;;  %v549_v19 = vld [vmem:[%s1297_s3] sm:$0x3] }
 0x108   : > { %v487_v32 = vmax.f32 %v485_v18, %v486_v25  ;;  %v524_v33 = vsel %vm460_vm2, %v454_v26, -inf  ;;  %v457_v36 = vadd.f32 %v856_v30, %v1151_v13  ;;  %896 = vmatprep.subr.bf16.mxu1 %v1041_v9  ;;  %v448_v37 = vpop.f32.mrb[15].mxu0  ;;  %v679_v21 = vlaneseq }
 0x109   : > { %v539_v39 = vadd.f32 %v496_v28, %v1162_v31  ;;  %v540_v40 = vadd.f32 %v496_v28, %v1170_v38  ;;  %v511_v41 = vrot.slane %v510_v17, 2  ;;  %v501_v43 = vmax.f32 %v499_v22, %v500_v29 }
 0x10a   : > { %v537_v44 = vadd.f32 %v487_v32, %v1165_v34  ;;  %v538_v45 = vadd.f32 %v487_v32, %v1175_v42  ;;  %v525_v46 = vsel %vm460_vm2, %v457_v36, -inf  ;;  %v515_v52 = vsel %vm460_vm2, %v446_v35, -inf }
 0x10b   : > { %v905_v47 = vpack.c.bf16 %v540_v40, %v539_v39  ;;  %v512_v48 = vmax.f32 %v510_v17, %v511_v41  ;;  %v502_v49 = vrot.slane %v501_v43, 2  ;;  %v526_v50 = vmax.f32 %v524_v33, %v525_v46 }
 0x10c   : > { %v901_v51 = vpack.c.bf16 %v538_v45, %v537_v44  ;;  %v449_v53 = vadd.f32 %v1151_v13, %v448_v37  ;;  %v680_v22 = vshrl.u32 %v679_v21, 7 }
 0x10d   : > { %v513_v31 = vrot.slane %v512_v48, 1  ;;  %v503_v54 = vmax.f32 %v501_v43, %v502_v49  ;;  %v527_v38 = vrot.slane %v526_v50, 4 }
 0x10e   : > { %v516_v56 = vsel %vm460_vm2, %v449_v53, -inf  ;;  %v681_v23 = vsub.s32 0, %v680_v22 }
 0x10f   : > { %v514_v57 = vmax.f32 %v512_v48, %v513_v31  ;;  %v504_v34 = vrot.slane %v503_v54, 1  ;;  %v528_v58 = vmax.f32 %v526_v50, %v527_v38  ;;  %v517_v42 = vmax.f32 %v515_v52, %v516_v56  ;;  %899 = vmatpush3.bf16.xpose.msk.msra.mxu1 %vm1197_vm3, %v897_v11 }
 0x110   : > { %900 = vmatprep.subr.bf16.mxu1 %v1041_v9 }
 0x111   : > { %v543_v60 = vadd.f32 %v514_v57, %v1182_v55  ;;  %v544_v61 = vadd.f32 %v514_v57, %v441_v0  ;;  %v505_v62 = vmax.f32 %v503_v54, %v504_v34  ;;  %v529_v63 = vrot.slane %v528_v58, 2 }
 0x112   : > { %v518_v13 = vrot.slane %v517_v42, 4 }
 0x113   : > { %v913_v1 = vpack.c.bf16 %v544_v61, %v543_v60  ;;  %v541_v2 = vadd.f32 %v505_v62, %v1185_v59  ;;  %v542_v3 = vadd.f32 %v505_v62, %v433_v10  ;;  %v530_v4 = vmax.f32 %v528_v58, %v529_v63 }
 0x114   : > { %v519_v5 = vmax.f32 %v517_v42, %v518_v13 }
 0x115   : > { %v909_v6 = vpack.c.bf16 %v542_v3, %v541_v2  ;;  %v531_v7 = vrot.slane %v530_v4, 1 }
 0x116   : > { %v520_v8 = vrot.slane %v519_v5, 2 }
 0x117   : > { %v532_v12 = vmax.f32 %v530_v4, %v531_v7  ;;  %903 = vmatpush3.bf16.xpose.msk.msra.mxu1 %vm1197_vm3, %v901_v51 }
 0x118   : > { %v521_v11 = vmax.f32 %v519_v5, %v520_v8  ;;  %904 = vmatprep.subr.bf16.mxu1 %v1041_v9 }
 0x119   : > { %v547_v55 = vadd.f32 %v532_v12, %v454_v26  ;;  %v548_v0 = vadd.f32 %v532_v12, %v457_v36 }
 0x11a   : > { %v522_v14 = vrot.slane %v521_v11, 1 }
 0x11b   : > { %v921_v16 = vpack.c.bf16 %v548_v0, %v547_v55 }
 0x11c   : > { %v523_v18 = vmax.f32 %v521_v11, %v522_v14 }
 0x11e   : > { %v545_v59 = vadd.f32 %v523_v18, %v446_v35  ;;  %v546_v10 = vadd.f32 %v523_v18, %v449_v53 }
 0x11f   : > { %907 = vmatpush3.bf16.xpose.msk.msra.mxu1 %vm1197_vm3, %v905_v47 }
 0x120   : > { %v917_v20 = vpack.c.bf16 %v546_v10, %v545_v59  ;;  %908 = vmatprep.subr.bf16.mxu1 %v1041_v9 }
 0x127   : > { %911 = vmatpush3.bf16.xpose.msk.msra.mxu1 %vm1197_vm3, %v909_v6 }
 0x128   : > { %912 = vmatprep.subr.bf16.mxu1 %v1041_v9 }
 0x12f   : > { %915 = vmatpush3.bf16.xpose.msk.msra.mxu1 %vm1197_vm3, %v913_v1 }
 0x130   : > { %916 = vmatprep.subr.bf16.mxu1 %v1041_v9 }
 0x137   : > { %919 = vmatpush3.bf16.xpose.msk.msra.mxu1 %vm1197_vm3, %v917_v20 }
 0x138   : > { %920 = vmatprep.subr.bf16.mxu1 %v1041_v9  ;;  %v677_v9 = vld [vmem:[%s265_s10] sm:$0x1] }
 0x139   : > { %v678_v15 = vunpack.c.l.bf16 %v677_v9 }
 0x13b   : > { %v682_v25 = vrot.slane %v678_v15, %v681_v23 }
 0x13f   : > { %923 = vmatpush3.bf16.xpose.msk.msra.mxu1 %vm1197_vm3, %v921_v16 }
 0x146   : > { %890 = vmatmul.mubr.msk.f32.vlgmr.msra.gmra.mrb[0].mxu1 %vm460_vm2, %v549_v19 }
 0x219   : > { %v673_v26 = vpop.f32.mrb[0].mxu1 }
 0x21a   : > { %v674_v27 = vadd.f32 %v673_v26, %v554_v24  ;;  %v891_v28 = vpop.f32.mrb[1].mxu1 }
 0x21c   : > { %v683_v17 = vmul.f32 %v682_v25, %v674_v27 }
 0x21e   : > { %684 = vst [vmem:[%s256_s14] sm:$0x3] %v683_v17 }
 0x21f   : > { %990 = shalt.err (!%p987_p4)
}
 0x220   : > { %s991_s29 = scalar_lea.hbm %s1252_s18, 32  ;;  %s995_s11 = scalar_lea.hbm %s1300_s6, 64 }
 0x221   : > { %p992_p7 = scmp.ne.s32.totalorder %s1252_s18, %s991_s29  ;;  %p996_p10 = scmp.lt.u32.totalorder %s1252_s18, %s1300_s6 }
 0x222   : > { %p997_p11 = scmp.lt.u32.totalorder %s995_s11, %s991_s29  ;;  %p999_p13 = scmp.lt.u32.totalorder %s991_s29, %s1252_s18 }
 0x223   : > { %p993_p8 = pnand %p992_p7, %p1119_p5 }
 0x224   : > { %p998_p12 = por %p997_p11, %p996_p10 }
 0x225   : > { %p994_p9 = pneg %p993_p8 }
 0x226   : > { %p1000_p0 = por %p999_p13, %p998_p12 }
 0x228   : > { %p1001_p1 = pnand %p1000_p0, %p994_p9 }
 0x22a   : > { %1004 = shalt.err (!%p1001_p1)
}
 0x22b   : > { %924 = dma.vmem_to_hbm [thread:$0]  (%p1119_p5), %s1254_s15, 32, %s1252_s18, %s686_s19  }
 0x22c PF: > { %p930_p2 = scmp.ge.s32.totalorder %s1039_s24, 2  ;;  %s711_s14 = sand.u32 1, %s1027_s21  }
 0x22d   : > { %s712_s16 = scalar_lea.sflag [#allocation3], %s711_s14 }
 0x22e   : > { %p927_p3 = pnand %p930_p2, %p1123_p6 }
 0x230   : > { %1022 = dma.done.wait (!%p927_p3), %s712_s16, 32  }
 0x231   : > { %1024 = vsyncadd (!%p927_p3), %s712_s16, 4294967264  ;;  %p16_p4 = scmp.ge.s32.totalorder %s1106_s27, 4   ;;  %s1305_s21 = smov %s1031_s22 }
 0x232   : > { %s1306_s22 = smov %s1035_s23  ;;  %s1307_s23 = smov %s1117_s30 }
 0x233   : > { %s1308_s24 = smov %s1106_s27  ;;  %18 = sbr.rel (!%p16_p4) target bundleno = 3 (0x3), region = 82 }
 0x23a   :  { %717 = vsyncpa [#allocation3], 1 }
 0x23b   :  { %719 = vsyncpa [#allocation3 + $0x1], 1 }

</bundles_post_ra>
